<compile_context>
chip_gen: v7x
topology: tpu7x:2x2x1
jax: 0.10.0
libtpu: 0.0.40
codegen_flags: <defaults>
</compile_context>

<pallas_src>
import jax
import jax.numpy as jnp
import numpy as np
from jax.experimental import pallas as pl
from jax.experimental.pallas import tpu as pltpu  # noqa: F401  (kept for TPU-specific tuning hooks)

# ----------------------------- config ---------------------------------------
B = 2            # batch
S = 8            # sequence length
E = 32           # hidden_dim
NUM_HEADS = 4
HEAD_DIM = E // NUM_HEADS
FF = 64          # feedforward_dim
EPS = 1e-12      # layer_norm_eps (PyTorch nn.LayerNorm default)
R = B * S        # flattened rows

# rows of the packed (9, E) vector slab
_BQ, _BK, _BV, _BO, _B2, _G1, _BETA1, _G2, _BETA2 = range(9)


# ----------------------------- kernel helpers --------------------------------
def _layer_norm(y, gamma, beta, eps):
    mean = jnp.mean(y, axis=-1, keepdims=True)
    var = jnp.mean((y - mean) * (y - mean), axis=-1, keepdims=True)
    return (y - mean) * jax.lax.rsqrt(var + eps) * gamma + beta


def _gelu_exact(x):
    # PyTorch nn.GELU() default: exact erf formulation.
    return 0.5 * x * (1.0 + jax.lax.erf(x * (1.0 / np.sqrt(2.0))))


# ----------------------------- kernel -----------------------------------------
def bert_layer_kernel(x_ref, wqkv_ref, wo_ref, w1_ref, b1_ref, w2_ref, vecs_ref,
                      o_ref):
    # TODO(synk): key_padding_mask is not supported (forward is called with None).
    x = x_ref[...]                 # (R, E) = (B*S, E) flattened activations
    vecs = vecs_ref[...]           # (9, E) packed bias / gamma / beta rows

    # ---- fused QKV projection: single MXU push --------------------------------
    qkv = jnp.dot(x, wqkv_ref[...], preferred_element_type=jnp.float32)   # (R, 3E)

    # Slice q/k/v, add biases and view per-batch.  (R, E) -> (B, S, E) is a
    # sublane-preserving leading-dim split (no relayout).
    q = (qkv[:, 0 * E:1 * E] + vecs[_BQ:_BQ + 1, :]).reshape(B, S, E)
    k = (qkv[:, 1 * E:2 * E] + vecs[_BK:_BK + 1, :]).reshape(B, S, E)
    v = (qkv[:, 2 * E:3 * E] + vecs[_BV:_BV + 1, :]).reshape(B, S, E)

    # ---- multi-head self attention: batched over B, static unroll over heads --
    scale = 1.0 / np.sqrt(HEAD_DIM)
    head_outs = []
    for h in range(NUM_HEADS):
        sl = slice(h * HEAD_DIM, (h + 1) * HEAD_DIM)
        qh, kh, vh = q[:, :, sl], k[:, :, sl], v[:, :, sl]     # (B, S, HD)
        s = jnp.einsum("bqd,bkd->bqk", qh, kh,
                       preferred_element_type=jnp.float32) * scale        # (B, S, S)
        s = s - jnp.max(s, axis=-1, keepdims=True)
        p = jnp.exp(s)
        # divide -> EUP reciprocal (otherwise-idle slot)
        p = p * pl.reciprocal(jnp.sum(p, axis=-1, keepdims=True), approx=True)
        head_outs.append(jnp.einsum("bqk,bkd->bqd", p, vh,
                                    preferred_element_type=jnp.float32))   # (B, S, HD)
    attn = jnp.concatenate(head_outs, axis=-1).reshape(R, E)               # (R, E)

    attn = jnp.dot(attn, wo_ref[...], preferred_element_type=jnp.float32) \
        + vecs[_BO:_BO + 1, :]

    # residual + layer norm 1
    x1 = _layer_norm(x + attn, vecs[_G1:_G1 + 1, :], vecs[_BETA1:_BETA1 + 1, :], EPS)

    # ---- feed-forward ----------------------------------------------------------
    h1 = jnp.dot(x1, w1_ref[...], preferred_element_type=jnp.float32) + b1_ref[...]
    h1 = _gelu_exact(h1)
    h2 = jnp.dot(h1, w2_ref[...], preferred_element_type=jnp.float32) \
        + vecs[_B2:_B2 + 1, :]

    # residual + layer norm 2
    o_ref[...] = _layer_norm(x1 + h2, vecs[_G2:_G2 + 1, :],
                             vecs[_BETA2:_BETA2 + 1, :], EPS)


# ----------------------------- wrapper ------------------------------------------
def pack_params(p):
    """One-time packing of per-tensor params into the kernel's fused layout."""
    return {
        "w_qkv": jnp.concatenate([p["wq"], p["wk"], p["wv"]], axis=1),   # (E, 3E)
        "wo": p["wo"],                                                   # (E, E)
        "w1": p["w1"],                                                   # (E, FF)
        "b1": p["b1"],                                                   # (1, FF)
        "w2": p["w2"],                                                   # (FF, E)
        # packed (9, E): bq bk bv bo b2 g1 beta1 g2 beta2
        "vecs": jnp.concatenate([p["bq"], p["bk"], p["bv"], p["bo"], p["b2"],
                                 p["g1"], p["beta1"], p["g2"], p["beta2"]],
                                axis=0),
    }


@jax.jit
def bert_encoder_layer(x, packed):
    """x: (B, S, E) float32; packed: output of pack_params()."""
    x2 = x.reshape(R, E)   # flatten batch*seq outside the kernel (free metadata op)
    out = pl.pallas_call(
        bert_layer_kernel,
        out_shape=jax.ShapeDtypeStruct((R, E), jnp.float32),
        # gridless: whole (tiny) problem in a single invocation, all operands
        # resident in VMEM -> no per-grid-step pipeline overhead.
    )(x2, packed["w_qkv"], packed["wo"], packed["w1"], packed["b1"],
      packed["w2"], packed["vecs"])
    return out.reshape(B, S, E)


# ----------------------------- pure-JAX reference ---------------------------------
def reference(x, p):
    def ln(y, g, b):
        m = jnp.mean(y, axis=-1, keepdims=True)
        v = jnp.mean((y - m) ** 2, axis=-1, keepdims=True)
        return (y - m) / jnp.sqrt(v + EPS) * g + b

    q = x @ p["wq"] + p["bq"]
    k = x @ p["wk"] + p["bk"]
    v = x @ p["wv"] + p["bv"]
    q = q.reshape(B, S, NUM_HEADS, HEAD_DIM).transpose(0, 2, 1, 3)
    k = k.reshape(B, S, NUM_HEADS, HEAD_DIM).transpose(0, 2, 1, 3)
    v = v.reshape(B, S, NUM_HEADS, HEAD_DIM).transpose(0, 2, 1, 3)
    s = jnp.einsum("bhqd,bhkd->bhqk", q, k, precision="highest") / np.sqrt(HEAD_DIM)
    p_attn = jax.nn.softmax(s, axis=-1)
    o = jnp.einsum("bhqk,bhkd->bhqd", p_attn, v, precision="highest")
    o = o.transpose(0, 2, 1, 3).reshape(B, S, E)
    attn = o @ p["wo"] + p["bo"]
    x1 = ln(x + attn, p["g1"], p["beta1"])
    h1 = jax.nn.gelu(x1 @ p["w1"] + p["b1"], approximate=False)
    h2 = h1 @ p["w2"] + p["b2"]
    return ln(x1 + h2, p["g2"], p["beta2"])


# ----------------------------- main ------------------------------------------------
if __name__ == "__main__":
    key = jax.random.PRNGKey(0)
    keys = jax.random.split(key, 16)

    # nn.MultiheadAttention: in_proj_weight (3E, E), in_proj_bias (3E,)
    in_proj_w = jax.random.normal(keys[0], (3 * E, E), jnp.float32) * 0.05
    in_proj_b = jax.random.normal(keys[1], (3 * E,), jnp.float32) * 0.02
    out_proj_w = jax.random.normal(keys[2], (E, E), jnp.float32) * 0.05
    out_proj_b = jax.random.normal(keys[3], (E,), jnp.float32) * 0.02
    # FFN Linear weights are (out, in) in PyTorch.
    w1_t = jax.random.normal(keys[4], (FF, E), jnp.float32) * 0.05
    b1 = jax.random.normal(keys[5], (FF,), jnp.float32) * 0.02
    w2_t = jax.random.normal(keys[6], (E, FF), jnp.float32) * 0.05
    b2 = jax.random.normal(keys[7], (E,), jnp.float32) * 0.02
    g1 = 1.0 + 0.1 * jax.random.normal(keys[8], (E,), jnp.float32)
    beta1 = 0.1 * jax.random.normal(keys[9], (E,), jnp.float32)
    g2 = 1.0 + 0.1 * jax.random.normal(keys[10], (E,), jnp.float32)
    beta2 = 0.1 * jax.random.normal(keys[11], (E,), jnp.float32)

    # Pre-transpose (out,in) -> (in,out) so kernel does x @ W; biases -> (1, d).
    params = {
        "wq": in_proj_w[0 * E:1 * E].T, "wk": in_proj_w[1 * E:2 * E].T,
        "wv": in_proj_w[2 * E:3 * E].T,
        "bq": in_proj_b[0 * E:1 * E][None, :], "bk": in_proj_b[1 * E:2 * E][None, :],
        "bv": in_proj_b[2 * E:3 * E][None, :],
        "wo": out_proj_w.T, "bo": out_proj_b[None, :],
        "g1": g1[None, :], "beta1": beta1[None, :],
        "w1": w1_t.T, "b1": b1[None, :],
        "w2": w2_t.T, "b2": b2[None, :],
        "g2": g2[None, :], "beta2": beta2[None, :],
    }
    packed = pack_params(params)

    x = jax.random.normal(keys[12], (B, S, E), jnp.float32)

    out = bert_encoder_layer(x, packed)
    out = jax.block_until_ready(out)

    ref = reference(x, params)
    np.testing.assert_allclose(np.asarray(out), np.asarray(ref), rtol=5e-3, atol=5e-3)

    print("KERNEL_OK")
</pallas_src>

<mosaic_0001>
module attributes {stable_mosaic.version = 11 : i64} {
  func.func @bert_layer_kernel(%arg0: memref<16x32xf32, #tpu.memory_space<vmem>>, %arg1: memref<32x96xf32, #tpu.memory_space<vmem>>, %arg2: memref<32x32xf32, #tpu.memory_space<vmem>>, %arg3: memref<32x64xf32, #tpu.memory_space<vmem>>, %arg4: memref<1x64xf32, #tpu.memory_space<vmem>>, %arg5: memref<64x32xf32, #tpu.memory_space<vmem>>, %arg6: memref<9x32xf32, #tpu.memory_space<vmem>>, %arg7: memref<16x32xf32, #tpu.memory_space<vmem>>) attributes {dimension_semantics = [], scalar_prefetch = 0 : i64, scratch_operands = 0 : i64, tpu.core_type = #tpu.core_type<tc>} {
    %c0 = arith.constant 0 : index
    %c0_0 = arith.constant 0 : index
    %0 = vector.load %arg0[%c0, %c0_0] : memref<16x32xf32, #tpu.memory_space<vmem>>, vector<16x32xf32>
    %c0_1 = arith.constant 0 : index
    %c0_2 = arith.constant 0 : index
    %1 = vector.load %arg6[%c0_1, %c0_2] : memref<9x32xf32, #tpu.memory_space<vmem>>, vector<9x32xf32>
    %c0_3 = arith.constant 0 : index
    %c0_4 = arith.constant 0 : index
    %2 = vector.load %arg1[%c0_3, %c0_4] : memref<32x96xf32, #tpu.memory_space<vmem>>, vector<32x96xf32>
    %cst = arith.constant dense<0.000000e+00> : vector<16x96xf32>
    %3 = tpu.matmul %0, %2, %cst {dimension_numbers = #tpu.dot_dimension_numbers<[1], [0], [0], [1], [0, 0, 1, 1], [], []>} : vector<16x32xf32>, vector<32x96xf32>, vector<16x96xf32> -> vector<16x96xf32>
    %4 = vector.extract_strided_slice %3 {offsets = [0, 0], sizes = [16, 32], strides = [1, 1]} : vector<16x96xf32> to vector<16x32xf32>
    %5 = vector.extract_strided_slice %1 {offsets = [0, 0], sizes = [1, 32], strides = [1, 1]} : vector<9x32xf32> to vector<1x32xf32>
    %6 = vector.broadcast %5 : vector<1x32xf32> to vector<16x32xf32>
    %7 = arith.addf %4, %6 : vector<16x32xf32>
    %8 = vector.shape_cast %7 : vector<16x32xf32> to vector<2x8x32xf32>
    %9 = vector.extract_strided_slice %3 {offsets = [0, 32], sizes = [16, 32], strides = [1, 1]} : vector<16x96xf32> to vector<16x32xf32>
    %10 = vector.extract_strided_slice %1 {offsets = [1, 0], sizes = [1, 32], strides = [1, 1]} : vector<9x32xf32> to vector<1x32xf32>
    %11 = vector.broadcast %10 : vector<1x32xf32> to vector<16x32xf32>
    %12 = arith.addf %9, %11 : vector<16x32xf32>
    %13 = vector.shape_cast %12 : vector<16x32xf32> to vector<2x8x32xf32>
    %14 = vector.extract_strided_slice %3 {offsets = [0, 64], sizes = [16, 32], strides = [1, 1]} : vector<16x96xf32> to vector<16x32xf32>
    %15 = vector.extract_strided_slice %1 {offsets = [2, 0], sizes = [1, 32], strides = [1, 1]} : vector<9x32xf32> to vector<1x32xf32>
    %16 = vector.broadcast %15 : vector<1x32xf32> to vector<16x32xf32>
    %17 = arith.addf %14, %16 : vector<16x32xf32>
    %18 = vector.shape_cast %17 : vector<16x32xf32> to vector<2x8x32xf32>
    %19 = vector.extract_strided_slice %8 {offsets = [0, 0, 0], sizes = [2, 8, 8], strides = [1, 1, 1]} : vector<2x8x32xf32> to vector<2x8x8xf32>
    %20 = vector.extract_strided_slice %13 {offsets = [0, 0, 0], sizes = [2, 8, 8], strides = [1, 1, 1]} : vector<2x8x32xf32> to vector<2x8x8xf32>
    %21 = vector.extract_strided_slice %18 {offsets = [0, 0, 0], sizes = [2, 8, 8], strides = [1, 1, 1]} : vector<2x8x32xf32> to vector<2x8x8xf32>
    "tpu.trace_start"() <{level = 10 : i32, message = "bqd,bkd->bqk"}> : () -> ()
    %cst_5 = arith.constant dense<0.000000e+00> : vector<2x8x8xf32>
    %22 = tpu.matmul %19, %20, %cst_5 {dimension_numbers = #tpu.dot_dimension_numbers<[2], [2], [1], [1], [0, 0, 0, 1, 1, 1], [0], [0]>} : vector<2x8x8xf32>, vector<2x8x8xf32>, vector<2x8x8xf32> -> vector<2x8x8xf32>
    "tpu.trace_stop"() : () -> ()
    %cst_6 = arith.constant 0.353553385 : f32
    %23 = vector.broadcast %cst_6 : f32 to vector<2x8x8xf32>
    %24 = arith.mulf %22, %23 : vector<2x8x8xf32>
    %cst_7 = arith.constant dense<0xFF800000> : vector<2x8xf32>
    %25 = vector.multi_reduction <maximumf>, %24, %cst_7 [2] : vector<2x8x8xf32> to vector<2x8xf32>
    %26 = vector.shape_cast %25 : vector<2x8xf32> to vector<2x8x1xf32>
    %27 = vector.broadcast %26 : vector<2x8x1xf32> to vector<2x8x8xf32>
    %28 = arith.subf %24, %27 : vector<2x8x8xf32>
    %29 = math.exp %28 : vector<2x8x8xf32>
    %cst_8 = arith.constant dense<0.000000e+00> : vector<2x8xf32>
    %30 = vector.multi_reduction <add>, %29, %cst_8 [2] : vector<2x8x8xf32> to vector<2x8xf32>
    %31 = vector.shape_cast %30 : vector<2x8xf32> to vector<2x8x1xf32>
    %32 = tpu.reciprocal %31 {approx = true} : vector<2x8x1xf32> -> vector<2x8x1xf32>
    %33 = vector.broadcast %32 : vector<2x8x1xf32> to vector<2x8x8xf32>
    %34 = arith.mulf %29, %33 : vector<2x8x8xf32>
    "tpu.trace_start"() <{level = 10 : i32, message = "bqk,bkd->bqd"}> : () -> ()
    %cst_9 = arith.constant dense<0.000000e+00> : vector<2x8x8xf32>
    %35 = tpu.matmul %34, %21, %cst_9 {dimension_numbers = #tpu.dot_dimension_numbers<[2], [1], [1], [2], [0, 0, 0, 1, 1, 2], [0], [0]>} : vector<2x8x8xf32>, vector<2x8x8xf32>, vector<2x8x8xf32> -> vector<2x8x8xf32>
    "tpu.trace_stop"() : () -> ()
    %36 = vector.extract_strided_slice %8 {offsets = [0, 0, 8], sizes = [2, 8, 8], strides = [1, 1, 1]} : vector<2x8x32xf32> to vector<2x8x8xf32>
    %37 = vector.extract_strided_slice %13 {offsets = [0, 0, 8], sizes = [2, 8, 8], strides = [1, 1, 1]} : vector<2x8x32xf32> to vector<2x8x8xf32>
    %38 = vector.extract_strided_slice %18 {offsets = [0, 0, 8], sizes = [2, 8, 8], strides = [1, 1, 1]} : vector<2x8x32xf32> to vector<2x8x8xf32>
    "tpu.trace_start"() <{level = 10 : i32, message = "bqd,bkd->bqk"}> : () -> ()
    %cst_10 = arith.constant dense<0.000000e+00> : vector<2x8x8xf32>
    %39 = tpu.matmul %36, %37, %cst_10 {dimension_numbers = #tpu.dot_dimension_numbers<[2], [2], [1], [1], [0, 0, 0, 1, 1, 1], [0], [0]>} : vector<2x8x8xf32>, vector<2x8x8xf32>, vector<2x8x8xf32> -> vector<2x8x8xf32>
    "tpu.trace_stop"() : () -> ()
    %cst_11 = arith.constant 0.353553385 : f32
    %40 = vector.broadcast %cst_11 : f32 to vector<2x8x8xf32>
    %41 = arith.mulf %39, %40 : vector<2x8x8xf32>
    %cst_12 = arith.constant dense<0xFF800000> : vector<2x8xf32>
    %42 = vector.multi_reduction <maximumf>, %41, %cst_12 [2] : vector<2x8x8xf32> to vector<2x8xf32>
    %43 = vector.shape_cast %42 : vector<2x8xf32> to vector<2x8x1xf32>
    %44 = vector.broadcast %43 : vector<2x8x1xf32> to vector<2x8x8xf32>
    %45 = arith.subf %41, %44 : vector<2x8x8xf32>
    %46 = math.exp %45 : vector<2x8x8xf32>
    %cst_13 = arith.constant dense<0.000000e+00> : vector<2x8xf32>
    %47 = vector.multi_reduction <add>, %46, %cst_13 [2] : vector<2x8x8xf32> to vector<2x8xf32>
    %48 = vector.shape_cast %47 : vector<2x8xf32> to vector<2x8x1xf32>
    %49 = tpu.reciprocal %48 {approx = true} : vector<2x8x1xf32> -> vector<2x8x1xf32>
    %50 = vector.broadcast %49 : vector<2x8x1xf32> to vector<2x8x8xf32>
    %51 = arith.mulf %46, %50 : vector<2x8x8xf32>
    "tpu.trace_start"() <{level = 10 : i32, message = "bqk,bkd->bqd"}> : () -> ()
    %cst_14 = arith.constant dense<0.000000e+00> : vector<2x8x8xf32>
    %52 = tpu.matmul %51, %38, %cst_14 {dimension_numbers = #tpu.dot_dimension_numbers<[2], [1], [1], [2], [0, 0, 0, 1, 1, 2], [0], [0]>} : vector<2x8x8xf32>, vector<2x8x8xf32>, vector<2x8x8xf32> -> vector<2x8x8xf32>
    "tpu.trace_stop"() : () -> ()
    %53 = vector.extract_strided_slice %8 {offsets = [0, 0, 16], sizes = [2, 8, 8], strides = [1, 1, 1]} : vector<2x8x32xf32> to vector<2x8x8xf32>
    %54 = vector.extract_strided_slice %13 {offsets = [0, 0, 16], sizes = [2, 8, 8], strides = [1, 1, 1]} : vector<2x8x32xf32> to vector<2x8x8xf32>
    %55 = vector.extract_strided_slice %18 {offsets = [0, 0, 16], sizes = [2, 8, 8], strides = [1, 1, 1]} : vector<2x8x32xf32> to vector<2x8x8xf32>
    "tpu.trace_start"() <{level = 10 : i32, message = "bqd,bkd->bqk"}> : () -> ()
    %cst_15 = arith.constant dense<0.000000e+00> : vector<2x8x8xf32>
    %56 = tpu.matmul %53, %54, %cst_15 {dimension_numbers = #tpu.dot_dimension_numbers<[2], [2], [1], [1], [0, 0, 0, 1, 1, 1], [0], [0]>} : vector<2x8x8xf32>, vector<2x8x8xf32>, vector<2x8x8xf32> -> vector<2x8x8xf32>
    "tpu.trace_stop"() : () -> ()
    %cst_16 = arith.constant 0.353553385 : f32
    %57 = vector.broadcast %cst_16 : f32 to vector<2x8x8xf32>
    %58 = arith.mulf %56, %57 : vector<2x8x8xf32>
    %cst_17 = arith.constant dense<0xFF800000> : vector<2x8xf32>
    %59 = vector.multi_reduction <maximumf>, %58, %cst_17 [2] : vector<2x8x8xf32> to vector<2x8xf32>
    %60 = vector.shape_cast %59 : vector<2x8xf32> to vector<2x8x1xf32>
    %61 = vector.broadcast %60 : vector<2x8x1xf32> to vector<2x8x8xf32>
    %62 = arith.subf %58, %61 : vector<2x8x8xf32>
    %63 = math.exp %62 : vector<2x8x8xf32>
    %cst_18 = arith.constant dense<0.000000e+00> : vector<2x8xf32>
    %64 = vector.multi_reduction <add>, %63, %cst_18 [2] : vector<2x8x8xf32> to vector<2x8xf32>
    %65 = vector.shape_cast %64 : vector<2x8xf32> to vector<2x8x1xf32>
    %66 = tpu.reciprocal %65 {approx = true} : vector<2x8x1xf32> -> vector<2x8x1xf32>
    %67 = vector.broadcast %66 : vector<2x8x1xf32> to vector<2x8x8xf32>
    %68 = arith.mulf %63, %67 : vector<2x8x8xf32>
    "tpu.trace_start"() <{level = 10 : i32, message = "bqk,bkd->bqd"}> : () -> ()
    %cst_19 = arith.constant dense<0.000000e+00> : vector<2x8x8xf32>
    %69 = tpu.matmul %68, %55, %cst_19 {dimension_numbers = #tpu.dot_dimension_numbers<[2], [1], [1], [2], [0, 0, 0, 1, 1, 2], [0], [0]>} : vector<2x8x8xf32>, vector<2x8x8xf32>, vector<2x8x8xf32> -> vector<2x8x8xf32>
    "tpu.trace_stop"() : () -> ()
    %70 = vector.extract_strided_slice %8 {offsets = [0, 0, 24], sizes = [2, 8, 8], strides = [1, 1, 1]} : vector<2x8x32xf32> to vector<2x8x8xf32>
    %71 = vector.extract_strided_slice %13 {offsets = [0, 0, 24], sizes = [2, 8, 8], strides = [1, 1, 1]} : vector<2x8x32xf32> to vector<2x8x8xf32>
    %72 = vector.extract_strided_slice %18 {offsets = [0, 0, 24], sizes = [2, 8, 8], strides = [1, 1, 1]} : vector<2x8x32xf32> to vector<2x8x8xf32>
    "tpu.trace_start"() <{level = 10 : i32, message = "bqd,bkd->bqk"}> : () -> ()
    %cst_20 = arith.constant dense<0.000000e+00> : vector<2x8x8xf32>
    %73 = tpu.matmul %70, %71, %cst_20 {dimension_numbers = #tpu.dot_dimension_numbers<[2], [2], [1], [1], [0, 0, 0, 1, 1, 1], [0], [0]>} : vector<2x8x8xf32>, vector<2x8x8xf32>, vector<2x8x8xf32> -> vector<2x8x8xf32>
    "tpu.trace_stop"() : () -> ()
    %cst_21 = arith.constant 0.353553385 : f32
    %74 = vector.broadcast %cst_21 : f32 to vector<2x8x8xf32>
    %75 = arith.mulf %73, %74 : vector<2x8x8xf32>
    %cst_22 = arith.constant dense<0xFF800000> : vector<2x8xf32>
    %76 = vector.multi_reduction <maximumf>, %75, %cst_22 [2] : vector<2x8x8xf32> to vector<2x8xf32>
    %77 = vector.shape_cast %76 : vector<2x8xf32> to vector<2x8x1xf32>
    %78 = vector.broadcast %77 : vector<2x8x1xf32> to vector<2x8x8xf32>
    %79 = arith.subf %75, %78 : vector<2x8x8xf32>
    %80 = math.exp %79 : vector<2x8x8xf32>
    %cst_23 = arith.constant dense<0.000000e+00> : vector<2x8xf32>
    %81 = vector.multi_reduction <add>, %80, %cst_23 [2] : vector<2x8x8xf32> to vector<2x8xf32>
    %82 = vector.shape_cast %81 : vector<2x8xf32> to vector<2x8x1xf32>
    %83 = tpu.reciprocal %82 {approx = true} : vector<2x8x1xf32> -> vector<2x8x1xf32>
    %84 = vector.broadcast %83 : vector<2x8x1xf32> to vector<2x8x8xf32>
    %85 = arith.mulf %80, %84 : vector<2x8x8xf32>
    "tpu.trace_start"() <{level = 10 : i32, message = "bqk,bkd->bqd"}> : () -> ()
    %cst_24 = arith.constant dense<0.000000e+00> : vector<2x8x8xf32>
    %86 = tpu.matmul %85, %72, %cst_24 {dimension_numbers = #tpu.dot_dimension_numbers<[2], [1], [1], [2], [0, 0, 0, 1, 1, 2], [0], [0]>} : vector<2x8x8xf32>, vector<2x8x8xf32>, vector<2x8x8xf32> -> vector<2x8x8xf32>
    "tpu.trace_stop"() : () -> ()
    %87 = tpu.concatenate %35, %52, %69, %86 in 2 : vector<2x8x8xf32>, vector<2x8x8xf32>, vector<2x8x8xf32>, vector<2x8x8xf32> -> vector<2x8x32xf32>
    %88 = vector.shape_cast %87 : vector<2x8x32xf32> to vector<16x32xf32>
    %c0_25 = arith.constant 0 : index
    %c0_26 = arith.constant 0 : index
    %89 = vector.load %arg2[%c0_25, %c0_26] : memref<32x32xf32, #tpu.memory_space<vmem>>, vector<32x32xf32>
    %cst_27 = arith.constant dense<0.000000e+00> : vector<16x32xf32>
    %90 = tpu.matmul %88, %89, %cst_27 {dimension_numbers = #tpu.dot_dimension_numbers<[1], [0], [0], [1], [0, 0, 1, 1], [], []>} : vector<16x32xf32>, vector<32x32xf32>, vector<16x32xf32> -> vector<16x32xf32>
    %91 = vector.extract_strided_slice %1 {offsets = [3, 0], sizes = [1, 32], strides = [1, 1]} : vector<9x32xf32> to vector<1x32xf32>
    %92 = vector.broadcast %91 : vector<1x32xf32> to vector<16x32xf32>
    %93 = arith.addf %90, %92 : vector<16x32xf32>
    %94 = arith.addf %0, %93 : vector<16x32xf32>
    %95 = vector.extract_strided_slice %1 {offsets = [5, 0], sizes = [1, 32], strides = [1, 1]} : vector<9x32xf32> to vector<1x32xf32>
    %96 = vector.extract_strided_slice %1 {offsets = [6, 0], sizes = [1, 32], strides = [1, 1]} : vector<9x32xf32> to vector<1x32xf32>
    %cst_28 = arith.constant dense<0.000000e+00> : vector<16xf32>
    %97 = vector.multi_reduction <add>, %94, %cst_28 [1] : vector<16x32xf32> to vector<16xf32>
    %98 = vector.shape_cast %97 : vector<16xf32> to vector<16x1xf32>
    %cst_29 = arith.constant 3.200000e+01 : f32
    %99 = vector.broadcast %cst_29 : f32 to vector<16x1xf32>
    %100 = arith.divf %98, %99 : vector<16x1xf32>
    %101 = vector.broadcast %100 : vector<16x1xf32> to vector<16x32xf32>
    %102 = arith.subf %94, %101 : vector<16x32xf32>
    %103 = vector.broadcast %100 : vector<16x1xf32> to vector<16x32xf32>
    %104 = arith.subf %94, %103 : vector<16x32xf32>
    %105 = arith.mulf %102, %104 : vector<16x32xf32>
    %cst_30 = arith.constant dense<0.000000e+00> : vector<16xf32>
    %106 = vector.multi_reduction <add>, %105, %cst_30 [1] : vector<16x32xf32> to vector<16xf32>
    %107 = vector.shape_cast %106 : vector<16xf32> to vector<16x1xf32>
    %cst_31 = arith.constant 3.200000e+01 : f32
    %108 = vector.broadcast %cst_31 : f32 to vector<16x1xf32>
    %109 = arith.divf %107, %108 : vector<16x1xf32>
    %110 = vector.broadcast %100 : vector<16x1xf32> to vector<16x32xf32>
    %111 = arith.subf %94, %110 : vector<16x32xf32>
    %cst_32 = arith.constant 9.99999996E-13 : f32
    %112 = vector.broadcast %cst_32 : f32 to vector<16x1xf32>
    %113 = arith.addf %109, %112 : vector<16x1xf32>
    %114 = math.rsqrt %113 : vector<16x1xf32>
    %115 = vector.broadcast %114 : vector<16x1xf32> to vector<16x32xf32>
    %116 = arith.mulf %111, %115 : vector<16x32xf32>
    %117 = vector.broadcast %95 : vector<1x32xf32> to vector<16x32xf32>
    %118 = arith.mulf %116, %117 : vector<16x32xf32>
    %119 = vector.broadcast %96 : vector<1x32xf32> to vector<16x32xf32>
    %120 = arith.addf %118, %119 : vector<16x32xf32>
    %c0_33 = arith.constant 0 : index
    %c0_34 = arith.constant 0 : index
    %121 = vector.load %arg3[%c0_33, %c0_34] : memref<32x64xf32, #tpu.memory_space<vmem>>, vector<32x64xf32>
    %cst_35 = arith.constant dense<0.000000e+00> : vector<16x64xf32>
    %122 = tpu.matmul %120, %121, %cst_35 {dimension_numbers = #tpu.dot_dimension_numbers<[1], [0], [0], [1], [0, 0, 1, 1], [], []>} : vector<16x32xf32>, vector<32x64xf32>, vector<16x64xf32> -> vector<16x64xf32>
    %c0_36 = arith.constant 0 : index
    %c0_37 = arith.constant 0 : index
    %123 = vector.load %arg4[%c0_36, %c0_37] : memref<1x64xf32, #tpu.memory_space<vmem>>, vector<1x64xf32>
    %124 = vector.broadcast %123 : vector<1x64xf32> to vector<16x64xf32>
    %125 = arith.addf %122, %124 : vector<16x64xf32>
    %cst_38 = arith.constant 5.000000e-01 : f32
    %126 = vector.broadcast %cst_38 : f32 to vector<16x64xf32>
    %127 = arith.mulf %126, %125 : vector<16x64xf32>
    %cst_39 = arith.constant 0.707106769 : f32
    %128 = vector.broadcast %cst_39 : f32 to vector<16x64xf32>
    %129 = arith.mulf %125, %128 : vector<16x64xf32>
    %130 = math.erf %129 : vector<16x64xf32>
    %cst_40 = arith.constant 1.000000e+00 : f32
    %131 = vector.broadcast %cst_40 : f32 to vector<16x64xf32>
    %132 = arith.addf %131, %130 : vector<16x64xf32>
    %133 = arith.mulf %127, %132 : vector<16x64xf32>
    %c0_41 = arith.constant 0 : index
    %c0_42 = arith.constant 0 : index
    %134 = vector.load %arg5[%c0_41, %c0_42] : memref<64x32xf32, #tpu.memory_space<vmem>>, vector<64x32xf32>
    %cst_43 = arith.constant dense<0.000000e+00> : vector<16x32xf32>
    %135 = tpu.matmul %133, %134, %cst_43 {dimension_numbers = #tpu.dot_dimension_numbers<[1], [0], [0], [1], [0, 0, 1, 1], [], []>} : vector<16x64xf32>, vector<64x32xf32>, vector<16x32xf32> -> vector<16x32xf32>
    %136 = vector.extract_strided_slice %1 {offsets = [4, 0], sizes = [1, 32], strides = [1, 1]} : vector<9x32xf32> to vector<1x32xf32>
    %137 = vector.broadcast %136 : vector<1x32xf32> to vector<16x32xf32>
    %138 = arith.addf %135, %137 : vector<16x32xf32>
    %139 = arith.addf %120, %138 : vector<16x32xf32>
    %140 = vector.extract_strided_slice %1 {offsets = [7, 0], sizes = [1, 32], strides = [1, 1]} : vector<9x32xf32> to vector<1x32xf32>
    %141 = vector.extract_strided_slice %1 {offsets = [8, 0], sizes = [1, 32], strides = [1, 1]} : vector<9x32xf32> to vector<1x32xf32>
    %cst_44 = arith.constant dense<0.000000e+00> : vector<16xf32>
    %142 = vector.multi_reduction <add>, %139, %cst_44 [1] : vector<16x32xf32> to vector<16xf32>
    %143 = vector.shape_cast %142 : vector<16xf32> to vector<16x1xf32>
    %cst_45 = arith.constant 3.200000e+01 : f32
    %144 = vector.broadcast %cst_45 : f32 to vector<16x1xf32>
    %145 = arith.divf %143, %144 : vector<16x1xf32>
    %146 = vector.broadcast %145 : vector<16x1xf32> to vector<16x32xf32>
    %147 = arith.subf %139, %146 : vector<16x32xf32>
    %148 = vector.broadcast %145 : vector<16x1xf32> to vector<16x32xf32>
    %149 = arith.subf %139, %148 : vector<16x32xf32>
    %150 = arith.mulf %147, %149 : vector<16x32xf32>
    %cst_46 = arith.constant dense<0.000000e+00> : vector<16xf32>
    %151 = vector.multi_reduction <add>, %150, %cst_46 [1] : vector<16x32xf32> to vector<16xf32>
    %152 = vector.shape_cast %151 : vector<16xf32> to vector<16x1xf32>
    %cst_47 = arith.constant 3.200000e+01 : f32
    %153 = vector.broadcast %cst_47 : f32 to vector<16x1xf32>
    %154 = arith.divf %152, %153 : vector<16x1xf32>
    %155 = vector.broadcast %145 : vector<16x1xf32> to vector<16x32xf32>
    %156 = arith.subf %139, %155 : vector<16x32xf32>
    %cst_48 = arith.constant 9.99999996E-13 : f32
    %157 = vector.broadcast %cst_48 : f32 to vector<16x1xf32>
    %158 = arith.addf %154, %157 : vector<16x1xf32>
    %159 = math.rsqrt %158 : vector<16x1xf32>
    %160 = vector.broadcast %159 : vector<16x1xf32> to vector<16x32xf32>
    %161 = arith.mulf %156, %160 : vector<16x32xf32>
    %162 = vector.broadcast %140 : vector<1x32xf32> to vector<16x32xf32>
    %163 = arith.mulf %161, %162 : vector<16x32xf32>
    %164 = vector.broadcast %141 : vector<1x32xf32> to vector<16x32xf32>
    %165 = arith.addf %163, %164 : vector<16x32xf32>
    %c0_49 = arith.constant 0 : index
    %c0_50 = arith.constant 0 : index
    %166 = vector.load %arg7[%c0_49, %c0_50] : memref<16x32xf32, #tpu.memory_space<vmem>>, vector<16x32xf32>
    tpu.vector_store %arg7[%c0_49, %c0_50], %165 {strides = array<i32>} : memref<16x32xf32, #tpu.memory_space<vmem>>, vector<16x32xf32>,
    return
  }
}

</mosaic_0001>

<bundles_post_ra>
// kernel: bert_encoder_layer.1
= control target key start
LH: loop header
LB: loop body
LE: loop exit
PB: predicated region body
PF: predicated region fallthrough
CT: control target
= control target key end

     0   :  { %12 = vsyncpa [#allocation3], 0  ;;  %s2676_s0 = inlined_call_operand.hbm [shape: f32[16,32], index: 0, kind: input, shape index: {}]   ;;  %s2677_s1 = inlined_call_operand.vmem [shape: f32[32,96], index: 1, kind: input, shape index: {}]   ;;  %s2678_s2 = inlined_call_operand.vmem [shape: f32[32,32], index: 2, kind: input, shape index: {}]   ;;  %s2679_s3 = inlined_call_operand.vmem [shape: f32[32,64], index: 3, kind: input, shape index: {}]   ;;  %s2680_s4 = inlined_call_operand.vmem [shape: f32[1,64], index: 4, kind: input, shape index: {}]   ;;  %s2681_s5 = inlined_call_operand.vmem [shape: f32[64,32], index: 5, kind: input, shape index: {}]   ;;  %s2682_s6 = inlined_call_operand.hbm [shape: f32[9,32], index: 6, kind: input, shape index: {}]   ;;  %s2683_s7 = inlined_call_operand.hbm [shape: f32[16,32], index: 7, kind: output, shape index: {}]  }
   0x1   :  { %13 = vsyncpa [#allocation6], 0 }
   0x2   :  { %14 = vsyncpa [#allocation4], 0  ;;  %s2323_s24 = smov [#allocation2]   ;;  %s2251_s28 = scalar_lea.hbm %s2676_s0, 256 }
   0x3   :  { %s20_s25 = sshll.u32 %s2323_s24, 4  ;;  %p2252_p0 = scmp.ne.s32.totalorder %s2676_s0, %s2251_s28  ;;  %s21_s25 = int_to_ptr.vmem [resolvable:$true] %s20_s25 }
   0x4   :  { %p2255_p1 = scmp.lt.u32.totalorder %s2251_s28, %s2676_s0 }
   0x6   :  { %p2257_p2 = pnand %p2255_p1, %p2252_p0 }
   0x8   :  { %2260 = shalt.err (!%p2257_p2)
}
   0x9   :  { %s2261_s10 = scalar_lea.vmem %s21_s25, 256  ;;  %p2266_p4 = scmp.lt.s32.totalorder %s21_s25, %s21_s25 }
   0xa   :  { %p2262_p3 = scmp.ne.s32.totalorder %s21_s25, %s2261_s10  ;;  %p2267_p5 = scmp.lt.s32.totalorder %s2261_s10, %s2261_s10 }
   0xc   :  { %p2268_p6 = por %p2267_p5, %p2266_p4 }
   0xe   :  { %p2269_p7 = pnand %p2268_p6, %p2262_p3 }
  0x10   :  { %2272 = shalt.err (!%p2269_p7)
}
  0x11   :  { %s2324_s11 = smov 128   ;;  %s2325_s12 = smov 8  }
  0x12   :  { %26 = dma.hbm_to_vmem [thread:$0]  %s2676_s0, 256, %s21_s25, [#allocation3], %s2324_s11, %s2324_s11, %s2325_s12  }
  0x13   :  { %s2326_s15 = smov [#allocation5]   ;;  %s2273_s19 = scalar_lea.hbm %s2682_s6, 256 }
  0x14   :  { %s42_s16 = sshll.u32 %s2326_s15, 4  ;;  %p2274_p8 = scmp.ne.s32.totalorder %s2682_s6, %s2273_s19  ;;  %s43_s16 = int_to_ptr.vmem [resolvable:$true] %s42_s16 }
  0x15   :  { %p2277_p9 = scmp.lt.u32.totalorder %s2273_s19, %s2682_s6 }
  0x17   :  { %p2279_p10 = pnand %p2277_p9, %p2274_p8 }
  0x19   :  { %2282 = shalt.err (!%p2279_p10)
}
  0x1a   :  { %s2283_s24 = scalar_lea.vmem %s43_s16, 256  ;;  %p2288_p12 = scmp.lt.s32.totalorder %s43_s16, %s43_s16 }
  0x1b   :  { %p2284_p11 = scmp.ne.s32.totalorder %s43_s16, %s2283_s24  ;;  %p2289_p13 = scmp.lt.s32.totalorder %s2283_s24, %s2283_s24 }
  0x1d   :  { %p2290_p0 = por %p2289_p13, %p2288_p12 }
  0x1f   :  { %p2291_p1 = pnand %p2290_p0, %p2284_p11 }
  0x21   :  { %2294 = shalt.err (!%p2291_p1)
}
  0x22   :  { %48 = dma.hbm_to_vmem [thread:$0]  %s2682_s6, 256, %s43_s16, [#allocation6], %s2324_s11, %s2324_s11, %s2325_s12  }
  0x23   :  { %2317 = dma.done.wait [#allocation3], 256  }
  0x24   :  { %2318 = vsyncadd [#allocation3], 4294967040 }
  0x25   :  { %2319 = dma.done.wait [#allocation6], 256  }
  0x26   :  { %2320 = vsyncadd [#allocation6], 4294967040  ;;  %v145_v0 = vlaneseq  ;;  %vm63_vm0 = vcmask 261120   ;;  %v59_v3 = vld [vmem:[%s2677_s1] sm:$0xff]  ;;  %v60_v4 = vld [vmem:[%s2677_s1 + $0x8] sm:$0xff]  ;;  %s2327_s10 = smov 32  }
  0x27   :  { %v61_v5 = vld [vmem:[%s2677_s1 + $0x10] sm:$0xff]  ;;  %v2146_v6 = vpack.c.bf16 %v60_v4, %v59_v3  ;;  %v62_v7 = vld [vmem:[%s2677_s1 + $0x18] sm:$0xff]  ;;  %v2429_v8 = vld [vmem:[#allocation2] sm:$0xff]  ;;  %v2328_v13 = vmov 0.0   ;;  %vm2329_vm1 = vmmov 0   ;;  %s2330_s1 = smov 96  }
  0x28   :  { %v2414_v1 = vshrl.u32 %v145_v0, 7  ;;  %v2150_v9 = vpack.c.bf16 %v62_v7, %v61_v5  ;;  %2022 = vmatprep.mubr.msk.f32.mxu1 %vm63_vm0, %v2429_v8  ;;  %v2433_v10 = vld [vmem:[#allocation5] sm:$0xff]  ;;  %v2436_v12 = vld [vmem:[#allocation2 + $0x8] sm:$0xff]  ;;  %2035 = vmatprep.subr.mxu0 %v2328_v13  ;;  %vm174_vm2 = vcmask 64512   ;;  %s2331_s13 = smov 64   ;;  %s2332_s14 = smov 88  }
  0x29   :  { %2147 = vmatprep.subr.bf16.mxu1 %v2146_v6  ;;  %2037 = vmatprep.mubr.msk.f32.mxu0 %vm2329_vm1, %v2328_v13  ;;  %s2333_s15 = smov 120   ;;  %s2334_s16 = smov 56   ;;  %vm1531_vm3 = vcmask 195584   ;;  %vm1528_vm4 = vcmask 130048   ;;  %vm1778_vm5 = vcmask 523264  }
  0x2a   :  { %v153_v2 = vsub.s32 1, %v2414_v1  ;;  %2149 = vmatpush3.bf16.msra.mxu1 %v2146_v6  ;;  %v147_v19 = vsub.s32 0, %v2414_v1  ;;  %v163_v33 = vsub.s32 2, %v2414_v1  ;;  %s2335_s17 = smov 80   ;;  %s2336_s18 = smov 112  }
  0x2b   :  { %2151 = vmatprep.subr.bf16.mxu1 %v2150_v9  ;;  %s2337_s19 = smov 48   ;;  %s2338_s20 = smov 72  }
  0x2c   :  { %v154_v11 = vrot.slane %v2433_v10, %v153_v2  ;;  %v148_v20 = vrot.slane %v2433_v10, %v147_v19  ;;  %v164_v34 = vrot.slane %v2433_v10, %v163_v33  ;;  %s2339_s21 = smov 104   ;;  %s2340_s22 = smov 40  }
  0x2d   :  { %s2341_s23 = smov 16   ;;  %s2342_s6 = smov 24  }
  0x2e   :  { %156 = vrot.lane.b32.xlu0 %v154_v11, %s2327_s10  ;;  %2153 = vmatpush3.bf16.msra.mxu1 %v2150_v9 }
  0x2f   :  { %2025 = vmatprep.subr.mxu1 %v2328_v13 }
  0x31   :  { %2023 = vmatmul.mubr.msk.f32.vlgmr.msra.gmra.mrb[0].mxu1 %vm63_vm0, %v2436_v12 }
  0x32   :  { %2027 = vmatprep.mubr.msk.f32.mxu1 %vm2329_vm1, %v2328_v13 }
  0xa0   :  { %v157_v14 = vpop.permute.xlu0 %156 }
 0x104   :  { %v2024_v15 = vpop.f32.mrb[0].mxu1 }
 0x105   :  { %v2446_v16 = vadd.f32 %v2024_v15, %v157_v14  ;;  %v136_v17 = vpop.f32.mrb[1].mxu1  ;;  %v2463_v24 = vadd.f32 %v2024_v15, %v148_v20 }
 0x106   :  { %v2448_v18 = vadd.f32 %v157_v14, %v136_v17  ;;  %v2455_v22 = vadd.f32 %v148_v20, %v136_v17 }
 0x107   :  { %251 = vrot.lane.b32.xlu1 %v2446_v16, %s2330_s1 }
 0x108   :  { %172 = vrot.lane.b32.xlu0 %v2448_v18, %s2330_s1 }
 0x179   :  { %v252_v23 = vpop.permute.xlu1 %251 }
 0x17a   :  { %v173_v21 = vpop.permute.xlu0 %172 }
 0x17b   :  { %2026 = vmatpush3.xpose.msk.msra.mxu1 %vm174_vm2, %v173_v21 }
 0x17c   :  { %2030 = vmatprep.subr.mxu1 %v2328_v13 }
 0x17e   :  { %2028 = vmatmul.mubr.msk.f32.vlgmr.msra.gmra.mrb[2].mxu1 %vm174_vm2, %v2455_v22 }
 0x17f   :  { %2031 = vmatpush3.xpose.msk.msra.mxu1 %vm174_vm2, %v252_v23  ;;  %2032 = vmatprep.mubr.msk.f32.mxu1 %vm2329_vm1, %v2328_v13 }
 0x180   :  { %2040 = vmatprep.subr.mxu1 %v2328_v13 }
 0x182   :  { %2033 = vmatmul.mubr.msk.f32.vlgmr.msra.gmra.mrb[4].mxu1 %vm174_vm2, %v2463_v24 }
 0x183   :  { %2042 = vmatprep.mubr.msk.f32.mxu1 %vm2329_vm1, %v2328_v13 }
 0x251   :  { %v246_v25 = vpop.f32.mrb[2].mxu1 }
 0x252   :  { %v328_v26 = vmul.f32 0.35355338, %v246_v25  ;;  %v2029_v27 = vpop.f32.mrb[3].mxu1 }
 0x254   :  { %v330_v28 = vsel %vm174_vm2, %v328_v26, -inf }
 0x255   :  { %331 = vmax.xlane.f32.xlu1 %v330_v28  ;;  %v324_v29 = vpop.f32.mrb[4].mxu1 }
 0x256   :  { %v329_v30 = vmul.f32 0.35355338, %v324_v29  ;;  %v2034_v31 = vpop.f32.mrb[5].mxu1 }
 0x258   :  { %v333_v32 = vsel %vm174_vm2, %v329_v30, -inf }
 0x259   :  { %334 = vmax.xlane.f32.xlu0 %v333_v32 }
 0x26f   :  { %166 = vrot.lane.b32.xlu0 %v164_v34, %s2331_s13 }
 0x2e2   :  { %v332_v39 = vpop.xlane.xlu1 %331 }
 0x2e3   :  { %v336_v40 = vsub.f32 %v328_v26, %v332_v39 }
 0x2e5   :  { %v338_v41 = vmul.f32 1.442695, %v336_v40 }
 0x2e6   :  { %v335_v35 = vpop.xlane.xlu0 %334 }
 0x2e7   :  { %v337_v42 = vsub.f32 %v329_v30, %v335_v35  ;;  %2207 = vpow2.f32 %v338_v41 }
 0x2e9   :  { %v340_v43 = vmul.f32 1.442695, %v337_v42 }
 0x2ea   :  { %v167_v36 = vpop.permute.xlu0 %166 }
 0x2eb   :  { %v2474_v37 = vadd.f32 %v167_v36, %v136_v17  ;;  %v2476_v38 = vadd.f32 %v2024_v15, %v167_v36  ;;  %2209 = vpow2.f32 %v340_v43 }
 0x2ed   :  { %430 = vrot.lane.b32.xlu0 %v2476_v38, %s2331_s13  ;;  %353 = vrot.lane.b32.xlu1 %v2474_v37, %s2331_s13 }
 0x2f1   :  { %508 = vrot.lane.b32.xlu0 %v2448_v18, %s2332_s14  ;;  %586 = vrot.lane.b32.xlu1 %v2446_v16, %s2332_s14  ;;  %v2208_v44 = vpop.eup %2207 }
 0x2f2   :  { %v342_v45 = vsel %vm174_vm2, %v2208_v44, 0.0 }
 0x2f5   :  { %506 = vrot.lane.b32.xlu0 %v2455_v22, %s2333_s15  ;;  %v2210_v46 = vpop.eup %2209 }
 0x2f6   :  { %v345_v47 = vsel %vm174_vm2, %v2210_v46, 0.0 }
 0x315   :  { %343 = vadd.xlane.f32.xlu1 %v342_v45 }
 0x319   :  { %346 = vadd.xlane.f32.xlu1 %v345_v47 }
 0x32a   :  { %584 = vrot.lane.b32.xlu1 %v2463_v24, %s2333_s15 }
 0x35f   :  { %v431_v48 = vpop.permute.xlu0 %430  ;;  %v354_v49 = vpop.permute.xlu1 %353 }
 0x360   :  { %2036 = vmatpush3.msra.mxu0 %v354_v49  ;;  %2041 = vmatpush3.msra.mxu1 %v431_v48 }
 0x361   :  { %2045 = vmatprep.subr.mxu0 %v2328_v13  ;;  %2050 = vmatprep.subr.mxu1 %v2328_v13 }
 0x363   :  { %v587_v50 = vpop.permute.xlu1 %586  ;;  %v509_v54 = vpop.permute.xlu0 %508 }
 0x367   :  { %v507_v58 = vpop.permute.xlu0 %506 }
 0x3a2   :  { %v344_v51 = vpop.xlane.xlu1 %343 }
 0x3a3   :  { %2211 = vrcp.f32 %v344_v51 }
 0x3a6   :  { %v347_v52 = vpop.xlane.xlu1 %346 }
 0x3a7   :  { %2213 = vrcp.f32 %v347_v52 }
 0x3aa   :  { %v585_v59 = vpop.permute.xlu1 %584 }
 0x3ad   :  { %v2212_v53 = vpop.eup %2211 }
 0x3ae   :  { %v350_v55 = vmul.f32 %v2212_v53, %v2208_v44 }
 0x3b0   :  { %2038 = vmatmul.mubr.msk.f32.vlgmr.msra.gmra.mrb[0].mxu0 %vm174_vm2, %v350_v55 }
 0x3b1   :  { %v2214_v56 = vpop.eup %2213  ;;  %2046 = vmatpush3.xpose.msk.msra.mxu0 %vm174_vm2, %v509_v54  ;;  %2047 = vmatprep.mubr.msk.f32.mxu0 %vm2329_vm1, %v2328_v13 }
 0x3b2   :  { %v351_v57 = vmul.f32 %v2214_v56, %v2210_v46  ;;  %2055 = vmatprep.subr.mxu0 %v2328_v13 }
 0x3b4   :  { %2043 = vmatmul.mubr.msk.f32.vlgmr.msra.gmra.mrb[6].mxu1 %vm174_vm2, %v351_v57  ;;  %2048 = vmatmul.mubr.msk.f32.vlgmr.msra.gmra.mrb[2].mxu0 %vm174_vm2, %v507_v58 }
 0x3b5   :  { %2051 = vmatpush3.xpose.msk.msra.mxu1 %vm174_vm2, %v587_v50  ;;  %2052 = vmatprep.mubr.msk.f32.mxu1 %vm2329_vm1, %v2328_v13 }
 0x3b6   :  { %2060 = vmatprep.subr.mxu1 %v2328_v13  ;;  %2057 = vmatprep.mubr.msk.f32.mxu0 %vm2329_vm1, %v2328_v13 }
 0x3b8   :  { %2053 = vmatmul.mubr.msk.f32.vlgmr.msra.gmra.mrb[8].mxu1 %vm174_vm2, %v585_v59 }
 0x3b9   :  { %2062 = vmatprep.mubr.msk.f32.mxu1 %vm2329_vm1, %v2328_v13 }
 0x483   :  { %v2504_v60 = vpop.f32.mrb[0].mxu0 }
 0x484   :  { %v2039_v61 = vpop.f32.mrb[1].mxu0 }
 0x487   :  { %v2506_v62 = vpop.f32.mrb[6].mxu1  ;;  %v580_v63 = vpop.f32.mrb[2].mxu0 }
 0x488   :  { %v662_v0 = vmul.f32 0.35355338, %v580_v63  ;;  %v2044_v2 = vpop.f32.mrb[7].mxu1  ;;  %v2049_v3 = vpop.f32.mrb[3].mxu0 }
 0x48a   :  { %v664_v4 = vsel %vm174_vm2, %v662_v0, -inf }
 0x48b   :  { %665 = vmax.xlane.f32.xlu0 %v664_v4  ;;  %v658_v5 = vpop.f32.mrb[8].mxu1 }
 0x48c   :  { %v663_v6 = vmul.f32 0.35355338, %v658_v5  ;;  %v2054_v7 = vpop.f32.mrb[9].mxu1 }
 0x48e   :  { %v667_v9 = vsel %vm174_vm2, %v663_v6, -inf }
 0x48f   :  { %668 = vmax.xlane.f32.xlu1 %v667_v9 }
 0x4a0   :  { %686 = vrot.lane.b32.xlu1 %v2474_v37, %s2334_s16 }
 0x4a1   :  { %762 = vrot.lane.b32.xlu0 %v2476_v38, %s2334_s16 }
 0x4a4   :  { %840 = vrot.lane.b32.xlu1 %v2448_v18, %s2335_s17 }
 0x4a8   :  { %918 = vrot.lane.b32.xlu1 %v2446_v16, %s2335_s17 }
 0x4ac   :  { %916 = vrot.lane.b32.xlu1 %v2463_v24, %s2336_s18 }
 0x518   :  { %v666_v11 = vpop.xlane.xlu0 %665 }
 0x519   :  { %v670_v14 = vsub.f32 %v662_v0, %v666_v11 }
 0x51b   :  { %v672_v15 = vmul.f32 1.442695, %v670_v14 }
 0x51c   :  { %v763_v17 = vpop.permute.xlu0 %762  ;;  %v669_v19 = vpop.xlane.xlu1 %668 }
 0x51d   :  { %2215 = vpow2.f32 %v672_v15  ;;  %v671_v20 = vsub.f32 %v663_v6, %v669_v19  ;;  %2061 = vmatpush3.msra.mxu1 %v763_v17 }
 0x51e   :  { %2070 = vmatprep.subr.mxu1 %v2328_v13 }
 0x51f   :  { %v674_v21 = vmul.f32 1.442695, %v671_v20 }
 0x520   :  { %v687_v23 = vpop.permute.xlu1 %686 }
 0x521   :  { %2217 = vpow2.f32 %v674_v21  ;;  %2056 = vmatpush3.msra.mxu0 %v687_v23 }
 0x522   :  { %2065 = vmatprep.subr.mxu0 %v2328_v13 }
 0x524   :  { %v841_v31 = vpop.permute.xlu1 %840 }
 0x527   :  { %v2216_v25 = vpop.eup %2215 }
 0x528   :  { %v676_v26 = vsel %vm174_vm2, %v2216_v25, 0.0  ;;  %v919_v35 = vpop.permute.xlu1 %918 }
 0x529   :  { %677 = vadd.xlane.f32.xlu0 %v676_v26 }
 0x52b   :  { %v2218_v27 = vpop.eup %2217 }
 0x52c   :  { %v679_v28 = vsel %vm174_vm2, %v2218_v27, 0.0  ;;  %v917_v40 = vpop.permute.xlu1 %916 }
 0x52d   :  { %680 = vadd.xlane.f32.xlu0 %v679_v28 }
 0x543   :  { %838 = vrot.lane.b32.xlu0 %v2455_v22, %s2336_s18 }
 0x5b6   :  { %v678_v29 = vpop.xlane.xlu0 %677 }
 0x5b7   :  { %2219 = vrcp.f32 %v678_v29 }
 0x5ba   :  { %v681_v30 = vpop.xlane.xlu0 %680 }
 0x5bb   :  { %2221 = vrcp.f32 %v681_v30 }
 0x5be   :  { %v839_v39 = vpop.permute.xlu0 %838 }
 0x5c1   :  { %v2220_v32 = vpop.eup %2219 }
 0x5c2   :  { %v684_v33 = vmul.f32 %v2220_v32, %v2216_v25 }
 0x5c4   :  { %2058 = vmatmul.mubr.msk.f32.vlgmr.msra.gmra.mrb[4].mxu0 %vm174_vm2, %v684_v33 }
 0x5c5   :  { %v2222_v34 = vpop.eup %2221  ;;  %2066 = vmatpush3.xpose.msk.msra.mxu0 %vm174_vm2, %v841_v31  ;;  %2067 = vmatprep.mubr.msk.f32.mxu0 %vm2329_vm1, %v2328_v13 }
 0x5c6   :  { %v685_v36 = vmul.f32 %v2222_v34, %v2218_v27  ;;  %2075 = vmatprep.subr.mxu0 %v2328_v13 }
 0x5c8   :  { %2063 = vmatmul.mubr.msk.f32.vlgmr.msra.gmra.mrb[10].mxu1 %vm174_vm2, %v685_v36  ;;  %2068 = vmatmul.mubr.msk.f32.vlgmr.msra.gmra.mrb[6].mxu0 %vm174_vm2, %v839_v39 }
 0x5c9   :  { %2071 = vmatpush3.xpose.msk.msra.mxu1 %vm174_vm2, %v919_v35  ;;  %2072 = vmatprep.mubr.msk.f32.mxu1 %vm2329_vm1, %v2328_v13 }
 0x5ca   :  { %2080 = vmatprep.subr.mxu1 %v2328_v13  ;;  %2077 = vmatprep.mubr.msk.f32.mxu0 %vm2329_vm1, %v2328_v13 }
 0x5cc   :  { %2073 = vmatmul.mubr.msk.f32.vlgmr.msra.gmra.mrb[12].mxu1 %vm174_vm2, %v917_v40 }
 0x5cd   :  { %2082 = vmatprep.mubr.msk.f32.mxu1 %vm2329_vm1, %v2328_v13 }
 0x697   :  { %v2536_v41 = vpop.f32.mrb[4].mxu0 }
 0x698   :  { %v2059_v42 = vpop.f32.mrb[5].mxu0 }
 0x69b   :  { %v2538_v43 = vpop.f32.mrb[10].mxu1  ;;  %v912_v44 = vpop.f32.mrb[6].mxu0 }
 0x69c   :  { %v994_v45 = vmul.f32 0.35355338, %v912_v44  ;;  %v2064_v46 = vpop.f32.mrb[11].mxu1  ;;  %v2069_v47 = vpop.f32.mrb[7].mxu0 }
 0x69e   :  { %v996_v48 = vsel %vm174_vm2, %v994_v45, -inf }
 0x69f   :  { %997 = vmax.xlane.f32.xlu0 %v996_v48  ;;  %v990_v49 = vpop.f32.mrb[12].mxu1  ;;  %v1534_v48 = vld [vmem:[%s2678_s2] sm:$0xff] }
 0x6a0   :  { %v995_v50 = vmul.f32 0.35355338, %v990_v49  ;;  %v2074_v51 = vpop.f32.mrb[13].mxu1 }
 0x6a1   :  { %v1537_v51 = vld [vmem:[%s2678_s2 + $0x18] sm:$0xff] }
 0x6a2   :  { %v999_v52 = vsel %vm174_vm2, %v995_v50, -inf }
 0x6a3   :  { %1000 = vmax.xlane.f32.xlu1 %v999_v52 }
 0x6b4   :  { %1018 = vrot.lane.b32.xlu1 %v2474_v37, %s2337_s19 }
 0x6b5   :  { %1094 = vrot.lane.b32.xlu0 %v2476_v38, %s2337_s19 }
 0x6b8   :  { %1172 = vrot.lane.b32.xlu1 %v2448_v18, %s2338_s20 }
 0x6bc   :  { %1250 = vrot.lane.b32.xlu1 %v2446_v16, %s2338_s20 }
 0x6c0   :  { %1248 = vrot.lane.b32.xlu1 %v2463_v24, %s2339_s21 }
 0x72c   :  { %v998_v53 = vpop.xlane.xlu0 %997 }
 0x72d   :  { %v1002_v54 = vsub.f32 %v994_v45, %v998_v53 }
 0x72f   :  { %v1004_v55 = vmul.f32 1.442695, %v1002_v54 }
 0x730   :  { %v1095_v56 = vpop.permute.xlu0 %1094  ;;  %v1001_v57 = vpop.xlane.xlu1 %1000 }
 0x731   :  { %2223 = vpow2.f32 %v1004_v55  ;;  %v1003_v58 = vsub.f32 %v995_v50, %v1001_v57  ;;  %2081 = vmatpush3.msra.mxu1 %v1095_v56  ;;  %v1536_v50 = vld [vmem:[%s2678_s2 + $0x10] sm:$0xff] }
 0x732   :  { %2090 = vmatprep.subr.mxu1 %v2328_v13  ;;  %v2158_v52 = vpack.c.bf16 %v1537_v51, %v1536_v50  ;;  %v1766_v51 = vld [vmem:[%s2681_s5] sm:$0xff] }
 0x733   :  { %v1006_v59 = vmul.f32 1.442695, %v1003_v58 }
 0x734   :  { %v1019_v61 = vpop.permute.xlu1 %1018 }
 0x735   :  { %2225 = vpow2.f32 %v1006_v59  ;;  %2076 = vmatpush3.msra.mxu0 %v1019_v61 }
 0x736   :  { %2085 = vmatprep.subr.mxu0 %v2328_v13 }
 0x738   :  { %v1173_v3 = vpop.permute.xlu1 %1172 }
 0x73b   :  { %v2224_v16 = vpop.eup %2223 }
 0x73c   :  { %v1008_v18 = vsel %vm174_vm2, %v2224_v16, 0.0  ;;  %v1251_v7 = vpop.permute.xlu1 %1250 }
 0x73d   :  { %1009 = vadd.xlane.f32.xlu0 %v1008_v18 }
 0x73f   :  { %v2226_v24 = vpop.eup %2225 }
 0x740   :  { %v1011_v63 = vsel %vm174_vm2, %v2226_v24, 0.0  ;;  %v1249_v11 = vpop.permute.xlu1 %1248 }
 0x741   :  { %1012 = vadd.xlane.f32.xlu0 %v1011_v63 }
 0x757   :  { %1170 = vrot.lane.b32.xlu0 %v2455_v22, %s2339_s21 }
 0x7ca   :  { %v1010_v0 = vpop.xlane.xlu0 %1009 }
 0x7cb   :  { %2227 = vrcp.f32 %v1010_v0 }
 0x7ce   :  { %v1013_v2 = vpop.xlane.xlu0 %1012 }
 0x7cf   :  { %2229 = vrcp.f32 %v1013_v2 }
 0x7d2   :  { %v1171_v22 = vpop.permute.xlu0 %1170 }
 0x7d5   :  { %v2228_v4 = vpop.eup %2227 }
 0x7d6   :  { %v1016_v5 = vmul.f32 %v2228_v4, %v2224_v16 }
 0x7d8   :  { %2078 = vmatmul.mubr.msk.f32.vlgmr.msra.gmra.mrb[8].mxu0 %vm174_vm2, %v1016_v5  ;;  %v1540_v5 = vsub.s32 3, %v2414_v1 }
 0x7d9   :  { %v2230_v6 = vpop.eup %2229  ;;  %2086 = vmatpush3.xpose.msk.msra.mxu0 %vm174_vm2, %v1173_v3  ;;  %2087 = vmatprep.mubr.msk.f32.mxu0 %vm2329_vm1, %v2328_v13 }
 0x7da   :  { %v1017_v9 = vmul.f32 %v2230_v6, %v2226_v24  ;;  %2095 = vmatprep.subr.mxu0 %v2328_v13  ;;  %v1541_v6 = vrot.slane %v2433_v10, %v1540_v5 }
 0x7dc   :  { %2083 = vmatmul.mubr.msk.f32.vlgmr.msra.gmra.mrb[14].mxu1 %vm174_vm2, %v1017_v9  ;;  %2088 = vmatmul.mubr.msk.f32.vlgmr.msra.gmra.mrb[10].mxu0 %vm174_vm2, %v1171_v22 }
 0x7dd   :  { %2091 = vmatpush3.xpose.msk.msra.mxu1 %vm174_vm2, %v1251_v7  ;;  %2092 = vmatprep.mubr.msk.f32.mxu1 %vm2329_vm1, %v2328_v13 }
 0x7de   :  { %2100 = vmatprep.subr.mxu1 %v2328_v13  ;;  %2097 = vmatprep.mubr.msk.f32.mxu0 %vm2329_vm1, %v2328_v13 }
 0x7e0   :  { %2093 = vmatmul.mubr.msk.f32.vlgmr.msra.gmra.mrb[16].mxu1 %vm174_vm2, %v1249_v11 }
 0x7e1   :  { %2102 = vmatprep.mubr.msk.f32.mxu1 %vm2329_vm1, %v2328_v13 }
 0x8ab   :  { %v1090_v14 = vpop.f32.mrb[8].mxu0 }
 0x8ac   :  { %v2079_v15 = vpop.f32.mrb[9].mxu0 }
 0x8af   :  { %v1166_v17 = vpop.f32.mrb[14].mxu1  ;;  %v1244_v19 = vpop.f32.mrb[10].mxu0 }
 0x8b0   :  { %v1326_v20 = vmul.f32 0.35355338, %v1244_v19  ;;  %v2084_v21 = vpop.f32.mrb[15].mxu1  ;;  %v2089_v23 = vpop.f32.mrb[11].mxu0 }
 0x8b2   :  { %v1328_v25 = vsel %vm174_vm2, %v1326_v20, -inf }
 0x8b3   :  { %1329 = vmax.xlane.f32.xlu0 %v1328_v25  ;;  %v1322_v26 = vpop.f32.mrb[16].mxu1 }
 0x8b4   :  { %v1327_v27 = vmul.f32 0.35355338, %v1322_v26  ;;  %v2094_v28 = vpop.f32.mrb[17].mxu1 }
 0x8b6   :  { %v1331_v29 = vsel %vm174_vm2, %v1327_v27, -inf }
 0x8b7   :  { %1332 = vmax.xlane.f32.xlu1 %v1331_v29  ;;  %v1665_v29 = vld [vmem:[%s2679_s3 + $0x8] sm:$0xff] }
 0x8c8   :  { %1350 = vrot.lane.b32.xlu1 %v2474_v37, %s2340_s22 }
 0x8cc   :  { %1504 = vrot.lane.b32.xlu1 %v2536_v41, %s2325_s12 }
 0x8d0   :  { %1506 = vrot.lane.b32.xlu1 %v2538_v43, %s2325_s12 }
 0x8d4   :  { %1514 = vrot.lane.b32.xlu1 %v1166_v17, %s2341_s23 }
 0x940   :  { %v1330_v13 = vpop.xlane.xlu0 %1329 }
 0x941   :  { %v1334_v30 = vsub.f32 %v1326_v20, %v1330_v13 }
 0x943   :  { %v1336_v31 = vmul.f32 1.442695, %v1334_v30  ;;  %v1666_v30 = vld [vmem:[%s2679_s3 + $0x10] sm:$0xff] }
 0x944   :  { %v1333_v32 = vpop.xlane.xlu1 %1332 }
 0x945   :  { %2231 = vpow2.f32 %v1336_v31  ;;  %v1335_v33 = vsub.f32 %v1327_v27, %v1333_v32  ;;  %v1667_v31 = vld [vmem:[%s2679_s3 + $0x18] sm:$0xff] }
 0x946   :  { %v2166_v32 = vpack.c.bf16 %v1667_v31, %v1666_v30 }
 0x947   :  { %v1338_v34 = vmul.f32 1.442695, %v1335_v33 }
 0x948   :  { %v1351_v35 = vpop.permute.xlu1 %1350 }
 0x949   :  { %2233 = vpow2.f32 %v1338_v34  ;;  %2096 = vmatpush3.msra.mxu0 %v1351_v35 }
 0x94c   :  { %v1505_v57 = vpop.permute.xlu1 %1504 }
 0x94d   :  { %v1526_v61 = vsel %vm174_vm2, %v2504_v60, %v1505_v57  ;;  %v1770_v57 = vld [vmem:[%s2681_s5 + $0x20] sm:$0xff] }
 0x94f   :  { %v2232_v36 = vpop.eup %2231 }
 0x950   :  { %v1340_v37 = vsel %vm174_vm2, %v2232_v36, 0.0  ;;  %v1507_v58 = vpop.permute.xlu1 %1506 }
 0x951   :  { %1341 = vadd.xlane.f32.xlu0 %v1340_v37  ;;  %v1527_v0 = vsel %vm174_vm2, %v2506_v62, %v1507_v58  ;;  %v1771_v58 = vld [vmem:[%s2681_s5 + $0x28] sm:$0xff] }
 0x953   :  { %v2234_v39 = vpop.eup %2233 }
 0x954   :  { %v1343_v40 = vsel %vm174_vm2, %v2234_v39, 0.0  ;;  %v1515_v16 = vpop.permute.xlu1 %1514 }
 0x955   :  { %1344 = vadd.xlane.f32.xlu0 %v1343_v40  ;;  %v1530_v2 = vsel %vm1528_vm4, %v1527_v0, %v1515_v16  ;;  %v1654_v40 = vsub.s32 5, %v2414_v1  ;;  %v1773_v16 = vld [vmem:[%s2681_s5 + $0x38] sm:$0xff] }
 0x96b   :  { %1426 = vrot.lane.b32.xlu0 %v2476_v38, %s2340_s22  ;;  %v1535_v38 = vld [vmem:[%s2678_s2 + $0x8] sm:$0xff] }
 0x96c   :  { %v2154_v49 = vpack.c.bf16 %v1535_v38, %v1534_v48 }
 0x96e   :  { %2155 = vmatprep.subr.bf16.mxu0 %v2154_v49 }
 0x96f   :  { %1512 = vrot.lane.b32.xlu0 %v1090_v14, %s2341_s23 }
 0x9de   :  { %v1342_v41 = vpop.xlane.xlu0 %1341 }
 0x9df   :  { %2235 = vrcp.f32 %v1342_v41  ;;  %v1660_v41 = vsub.s32 6, %v2414_v1 }
 0x9e2   :  { %v1345_v42 = vpop.xlane.xlu0 %1344 }
 0x9e3   :  { %2237 = vrcp.f32 %v1345_v42  ;;  %v1655_v42 = vrot.slane %v2433_v10, %v1654_v40 }
 0x9e6   :  { %v1427_v43 = vpop.permute.xlu0 %1426 }
 0x9e7   :  { %2101 = vmatpush3.msra.mxu1 %v1427_v43 }
 0x9e9   :  { %v2236_v44 = vpop.eup %2235 }
 0x9ea   :  { %v1348_v45 = vmul.f32 %v2236_v44, %v2232_v36  ;;  %v1513_v59 = vpop.permute.xlu0 %1512 }
 0x9eb   :  { %v1529_v18 = vsel %vm1528_vm4, %v1526_v61, %v1513_v59  ;;  %v2178_v59 = vpack.c.bf16 %v1771_v58, %v1770_v57  ;;  %v1772_v61 = vld [vmem:[%s2681_s5 + $0x30] sm:$0xff] }
 0x9ec   :  { %2098 = vmatmul.mubr.msk.f32.vlgmr.msra.gmra.mrb[12].mxu0 %vm174_vm2, %v1348_v45  ;;  %v1661_v45 = vrot.slane %v2433_v10, %v1660_v41 }
 0x9ed   :  { %v2238_v46 = vpop.eup %2237  ;;  %2157 = vmatpush3.bf16.msra.mxu0 %v2154_v49 }
 0x9ee   :  { %v1349_v47 = vmul.f32 %v2238_v46, %v2234_v39  ;;  %2159 = vmatprep.subr.bf16.mxu0 %v2158_v52 }
 0x9f0   :  { %2103 = vmatmul.mubr.msk.f32.vlgmr.msra.gmra.mrb[18].mxu1 %vm174_vm2, %v1349_v47 }
 0x9f1   :  { %2161 = vmatpush3.bf16.msra.mxu0 %v2158_v52  ;;  %v1767_v52 = vld [vmem:[%s2681_s5 + $0x8] sm:$0xff] }
 0xabf   :  { %v1422_v53 = vpop.f32.mrb[12].mxu0 }
 0xac0   :  { %1520 = vrot.lane.b32.xlu0 %v1422_v53, %s2342_s6  ;;  %v2099_v54 = vpop.f32.mrb[13].mxu0  ;;  %v2170_v53 = vpack.c.bf16 %v1767_v52, %v1766_v51 }
 0xac1   :  { %v1768_v54 = vld [vmem:[%s2681_s5 + $0x10] sm:$0xff] }
 0xac2   :  { %2171 = vmatprep.subr.bf16.mxu0 %v2170_v53 }
 0xac3   :  { %v1498_v55 = vpop.f32.mrb[18].mxu1 }
 0xac4   :  { %1522 = vrot.lane.b32.xlu1 %v1498_v55, %s2342_s6  ;;  %v2104_v56 = vpop.f32.mrb[19].mxu1  ;;  %v1769_v55 = vld [vmem:[%s2681_s5 + $0x18] sm:$0xff] }
 0xac5   :  { %v2174_v56 = vpack.c.bf16 %v1769_v55, %v1768_v54 }
 0xb32   :  { %v1521_v24 = vpop.permute.xlu0 %1520 }
 0xb33   :  { %v1532_v63 = vsel %vm1531_vm3, %v1529_v18, %v1521_v24  ;;  %v2182_v18 = vpack.c.bf16 %v1773_v16, %v1772_v61  ;;  %v1948_v24 = vld [vmem:[%s2680_s4] ss:$0 sm:$0xff]  ;;  %s2343_s4 = smov [#allocation7]  }
 0xb34   :  { %2113 = vmatprep.mubr.msk.f32.mxu0 %vm63_vm0, %v1532_v63  ;;  %s1907_s5 = sshll.u32 %s2343_s4, 4  ;;  %s1908_s5 = int_to_ptr.vmem [resolvable:$true] %s1907_s5 }
 0xb35   :  { %s2295_s2 = scalar_lea.vmem %s1908_s5, 256  ;;  %p2300_p3 = scmp.lt.s32.totalorder %s1908_s5, %s1908_s5 }
 0xb36   :  { %v1523_v3 = vpop.permute.xlu1 %1522  ;;  %p2296_p2 = scmp.ne.s32.totalorder %s1908_s5, %s2295_s2  ;;  %p2301_p4 = scmp.lt.s32.totalorder %s2295_s2, %s2295_s2 }
 0xb37   :  { %v1533_v4 = vsel %vm1531_vm3, %v1530_v2, %v1523_v3 }
 0xb38   :  { %2114 = vmatmul.mubr.msk.f32.vlgmr.msra.gmra.mrb[14].mxu0 %vm63_vm0, %v1533_v4  ;;  %p2302_p5 = por %p2301_p4, %p2300_p3 }
 0xb39   :  { %2173 = vmatpush3.bf16.msra.mxu0 %v2170_v53 }
 0xb3a   :  { %2175 = vmatprep.subr.bf16.mxu0 %v2174_v56  ;;  %p2303_p6 = pnand %p2302_p5, %p2296_p2 }
 0xb3d   :  { %2177 = vmatpush3.bf16.msra.mxu0 %v2174_v56 }
 0xb3e   :  { %2179 = vmatprep.subr.bf16.mxu0 %v2178_v59 }
 0xb41   :  { %2181 = vmatpush3.bf16.msra.mxu0 %v2178_v59 }
 0xb42   :  { %2183 = vmatprep.subr.bf16.mxu0 %v2182_v18 }
 0xb45   :  { %2185 = vmatpush3.bf16.msra.mxu0 %v2182_v18 }
 0xc0b   :  { %v2115_v60 = vpop.f32.mrb[14].mxu0 }
 0xc0c   :  { %v1620_v7 = vadd.f32 %v2115_v60, %v1541_v6  ;;  %v1614_v9 = vpop.f32.mrb[15].mxu0 }
 0xc0d   :  { %v1615_v22 = vadd.f32 %v1614_v9, %v1541_v6 }
 0xc0e   :  { %v1624_v11 = vadd.f32 %v1620_v7, %v2436_v12 }
 0xc0f   :  { %v1623_v14 = vadd.f32 %v1615_v22, %v2429_v8  ;;  %v1664_v8 = vld [vmem:[%s2679_s3] sm:$0xff] }
 0xc10   :  { %v1628_v15 = vsel %vm63_vm0, %v1624_v11, 0.0  ;;  %v2162_v13 = vpack.c.bf16 %v1665_v29, %v1664_v8 }
 0xc11   :  { %1629 = vadd.xlane.f32.xlu1 %v1628_v15  ;;  %v1625_v62 = vsel %vm63_vm0, %v1623_v14, 0.0 }
 0xc12   :  { %1626 = vadd.xlane.f32.xlu0 %v1625_v62  ;;  %2163 = vmatprep.subr.bf16.mxu1 %v2162_v13  ;;  %v1776_v62 = vsub.s32 4, %v2414_v1 }
 0xc13   :  { %2165 = vmatpush3.bf16.msra.mxu1 %v2162_v13 }
 0xc14   :  { %2167 = vmatprep.subr.bf16.mxu1 %v2166_v32 }
 0xc17   :  { %2169 = vmatpush3.bf16.msra.mxu1 %v2166_v32 }
 0xc9e   :  { %v1630_v17 = vpop.xlane.xlu1 %1629 }
 0xc9f   :  { %v1633_v19 = vmul.f32 0.03125, %v1630_v17  ;;  %v1627_v20 = vpop.xlane.xlu0 %1626  ;;  %v1777_v17 = vrot.slane %v2433_v10, %v1776_v62 }
 0xca0   :  { %v1632_v21 = vmul.f32 0.03125, %v1627_v20 }
 0xca1   :  { %v1635_v23 = vsub.f32 %v1624_v11, %v1633_v19 }
 0xca2   :  { %v1634_v25 = vsub.f32 %v1623_v14, %v1632_v21 }
 0xca3   :  { %v1637_v28 = vmul.f32 %v1635_v23, %v1635_v23 }
 0xca4   :  { %v1636_v26 = vmul.f32 %v1634_v25, %v1634_v25 }
 0xca5   :  { %v1641_v12 = vsel %vm63_vm0, %v1637_v28, 0.0 }
 0xca6   :  { %v1638_v27 = vsel %vm63_vm0, %v1636_v26, 0.0 }
 0xca7   :  { %1639 = vadd.xlane.f32.xlu0 %v1638_v27 }
 0xcab   :  { %1642 = vadd.xlane.f32.xlu0 %v1641_v12 }
 0xd34   :  { %v1640_v33 = vpop.xlane.xlu0 %1639 }
 0xd35   :  { %v1644_v34 = vmul.f32 0.03125, %v1640_v33 }
 0xd37   :  { %v1646_v35 = vadd.f32 1e-12, %v1644_v34 }
 0xd38   :  { %v1643_v36 = vpop.xlane.xlu0 %1642 }
 0xd39   :  { %2239 = vrsqrt.f32 %v1646_v35  ;;  %v1645_v37 = vmul.f32 0.03125, %v1643_v36 }
 0xd3b   :  { %v1647_v39 = vadd.f32 1e-12, %v1645_v37 }
 0xd3d   :  { %2241 = vrsqrt.f32 %v1647_v39 }
 0xd43   :  { %v2240_v43 = vpop.eup %2239 }
 0xd44   :  { %v1650_v44 = vmul.f32 %v2240_v43, %v1634_v25  ;;  %v1890_v43 = vsub.s32 7, %v2414_v1 }
 0xd46   :  { %v1656_v46 = vmul.f32 %v1655_v42, %v1650_v44  ;;  %v1891_v44 = vrot.slane %v2433_v10, %v1890_v43 }
 0xd47   :  { %v2242_v47 = vpop.eup %2241 }
 0xd48   :  { %v1651_v48 = vmul.f32 %v2242_v47, %v1635_v23  ;;  %v1662_v38 = vadd.f32 %v1661_v45, %v1656_v46 }
 0xd4a   :  { %v1657_v49 = vmul.f32 %v1655_v42, %v1651_v48  ;;  %2124 = vmatprep.mubr.msk.f32.mxu1 %vm63_vm0, %v1662_v38 }
 0xd4c   :  { %v1663_v50 = vadd.f32 %v1661_v45, %v1657_v49 }
 0xd4e   :  { %2125 = vmatmul.mubr.msk.f32.vlgmr.msra.gmra.mrb[20].mxu1 %vm63_vm0, %v1663_v50 }
 0xe21   :  { %v2126_v63 = vpop.f32.mrb[20].mxu1 }
 0xe22   :  { %v1753_v0 = vadd.f32 %v2126_v63, %v1948_v24  ;;  %v1747_v2 = vpop.f32.mrb[21].mxu1 }
 0xe23   :  { %v1748_v3 = vadd.f32 %v1948_v24, %v1747_v2 }
 0xe24   :  { %v1759_v4 = vmul.f32 0.70710677, %v1753_v0  ;;  %v1757_v11 = vmul.f32 0.5, %v1753_v0 }
 0xe25   :  { %v1758_v5 = vmul.f32 0.70710677, %v1748_v3  ;;  %v1756_v9 = vmul.f32 0.5, %v1748_v3 }
 0xe26   :  { %2243 = verf.f32 %v1759_v4 }
 0xe27   :  { %2245 = verf.f32 %v1758_v5 }
 0xe30   :  { %v2244_v6 = vpop.eup %2243 }
 0xe31   :  { %v2246_v60 = vpop.eup %2245  ;;  %v1763_v7 = vadd.f32 1.0, %v2244_v6 }
 0xe32   :  { %v1762_v22 = vadd.f32 1.0, %v2246_v60 }
 0xe33   :  { %v1765_v15 = vmul.f32 %v1763_v7, %v1757_v11 }
 0xe34   :  { %v1764_v14 = vmul.f32 %v1762_v22, %v1756_v9 }
 0xe36   :  { %2143 = vmatprep.mubr.msk.f32.mxu0 %vm1778_vm5, %v1764_v14 }
 0xe37   :  { %2144 = vmatmul.mubr.msk.f32.vlgmr.msra.gmra.mrb[16].mxu0 %vm1778_vm5, %v1765_v15 }
 0xf0a   :  { %v2145_v19 = vpop.f32.mrb[16].mxu0 }
 0xf0b   :  { %v1857_v20 = vadd.f32 %v2145_v19, %v1777_v17  ;;  %v1851_v21 = vpop.f32.mrb[17].mxu0 }
 0xf0c   :  { %v1852_v23 = vadd.f32 %v1851_v21, %v1777_v17 }
 0xf0d   :  { %v1861_v25 = vadd.f32 %v1857_v20, %v1663_v50 }
 0xf0e   :  { %v1860_v26 = vadd.f32 %v1852_v23, %v1662_v38  ;;  %v1953_v38 = vld [vmem:[#allocation5 + $0x8] ss:$0 sm:$0xff] }
 0xf0f   :  { %v1865_v27 = vsel %vm63_vm0, %v1861_v25, 0.0 }
 0xf10   :  { %1866 = vadd.xlane.f32.xlu0 %v1865_v27  ;;  %v1862_v28 = vsel %vm63_vm0, %v1860_v26, 0.0 }
 0xf11   :  { %1863 = vadd.xlane.f32.xlu1 %v1862_v28 }
 0xf9d   :  { %v1867_v12 = vpop.xlane.xlu0 %1866 }
 0xf9e   :  { %v1869_v8 = vmul.f32 0.03125, %v1867_v12  ;;  %v1864_v29 = vpop.xlane.xlu1 %1863 }
 0xf9f   :  { %v1868_v13 = vmul.f32 0.03125, %v1864_v29 }
 0xfa0   :  { %v1871_v30 = vsub.f32 %v1861_v25, %v1869_v8 }
 0xfa1   :  { %v1870_v31 = vsub.f32 %v1860_v26, %v1868_v13 }
 0xfa2   :  { %v1873_v32 = vmul.f32 %v1871_v30, %v1871_v30 }
 0xfa3   :  { %v1872_v33 = vmul.f32 %v1870_v31, %v1870_v31 }
 0xfa4   :  { %v1877_v34 = vsel %vm63_vm0, %v1873_v32, 0.0 }
 0xfa5   :  { %1878 = vadd.xlane.f32.xlu0 %v1877_v34  ;;  %v1874_v35 = vsel %vm63_vm0, %v1872_v33, 0.0 }
 0xfa6   :  { %1875 = vadd.xlane.f32.xlu1 %v1874_v35 }
0x1032   :  { %v1879_v36 = vpop.xlane.xlu0 %1878 }
0x1033   :  { %v1881_v37 = vmul.f32 0.03125, %v1879_v36  ;;  %v1876_v39 = vpop.xlane.xlu1 %1875 }
0x1034   :  { %v1880_v40 = vmul.f32 0.03125, %v1876_v39 }
0x1035   :  { %v1883_v41 = vadd.f32 1e-12, %v1881_v37 }
0x1036   :  { %v1882_v42 = vadd.f32 1e-12, %v1880_v40 }
0x1037   :  { %2247 = vrsqrt.f32 %v1883_v41 }
0x1038   :  { %2249 = vrsqrt.f32 %v1882_v42 }
0x1041   :  { %v2248_v45 = vpop.eup %2247 }
0x1042   :  { %v2250_v46 = vpop.eup %2249  ;;  %v1887_v47 = vmul.f32 %v2248_v45, %v1871_v30 }
0x1043   :  { %v1886_v48 = vmul.f32 %v2250_v46, %v1870_v31 }
0x1044   :  { %v1893_v49 = vmul.f32 %v1891_v44, %v1887_v47 }
0x1045   :  { %v1892_v50 = vmul.f32 %v1891_v44, %v1886_v48 }
0x1046   :  { %v1899_v51 = vadd.f32 %v1953_v38, %v1893_v49 }
0x1047   :  { %v1898_v52 = vadd.f32 %v1953_v38, %v1892_v50 }
0x1048   :  { %1901 = vst.msk [vmem:[#allocation7 + $0x8] sm:$0xff] %vm63_vm0, %v1899_v51 }
0x1049   :  { %1900 = vst.msk [vmem:[#allocation7] sm:$0xff] %vm63_vm0, %v1898_v52 }
0x104a   :  { %2306 = shalt.err (!%p2303_p6)
}
0x104b   :  { %s2307_s10 = scalar_lea.hbm %s2683_s7, 256 }
0x104c   :  { %p2308_p7 = scmp.ne.s32.totalorder %s2683_s7, %s2307_s10  ;;  %p2311_p8 = scmp.lt.u32.totalorder %s2307_s10, %s2683_s7 }
0x104e   :  { %p2313_p9 = pnand %p2311_p8, %p2308_p7 }
0x1050   :  { %2316 = shalt.err (!%p2313_p9)
}
0x1051   :  { %1913 = dma.vmem_to_hbm [thread:$0]  %s1908_s5, 256, %s2683_s7, [#allocation4], %s2324_s11, %s2324_s11, %s2325_s12  }
0x1052   :  { %2321 = dma.done.wait [#allocation4], 256  }
0x1053   :  { %2322 = vsyncadd [#allocation4], 4294967040 }
0x1054   :  { %1917 = vsyncpa [#allocation3], 1 }
0x1055   :  { %1918 = vsyncpa [#allocation6], 1 }
0x1056   :  { %1919 = vsyncpa [#allocation4], 1 }

</bundles_post_ra>
